<compile_context>
chip_gen: v6e
topology: v6e:2x2x1
jax: 0.10.0
libtpu: 0.0.40
codegen_flags: <defaults>
</compile_context>

<pallas_src>
import numpy as np
import jax
import jax.numpy as jnp
from jax.experimental import pallas as pl
from jax.experimental.pallas import tpu as pltpu


# ------------------------------ kernel bodies ------------------------------ #

def _glu_split_kernel(a_ref, b_ref, o_ref):
    """Halves already split by the BlockSpec index_maps: pure elementwise."""
    b = b_ref[...].astype(jnp.float32)
    gate = pl.reciprocal(1.0 + jnp.exp(-b), approx=False)      # EUP exp + rcp
    o_ref[...] = (a_ref[...].astype(jnp.float32) * gate).astype(o_ref.dtype)


def _glu_fused_mid_kernel(x_ref, o_ref):
    """Fallback (h not sublane-aligned). x_ref: (tm, 2h, tn), o_ref: (tm, h, tn)."""
    h = o_ref.shape[1]
    a = x_ref[:, :h, :].astype(jnp.float32)
    b = x_ref[:, h:, :].astype(jnp.float32)
    gate = pl.reciprocal(1.0 + jnp.exp(-b), approx=False)
    o_ref[...] = (a * gate).astype(o_ref.dtype)


def _glu_fused_last_kernel(x_ref, o_ref):
    """Fallback (h not lane-aligned). x_ref: (tm, 2h), o_ref: (tm, h)."""
    h = o_ref.shape[1]
    a = x_ref[:, :h].astype(jnp.float32)
    b = x_ref[:, h:].astype(jnp.float32)
    gate = pl.reciprocal(1.0 + jnp.exp(-b), approx=False)
    o_ref[...] = (a * gate).astype(o_ref.dtype)


# --------------------------------- helpers --------------------------------- #

def _prod(shape):
    out = 1
    for s in shape:
        out *= int(s)
    return out


def _round_up(x, m):
    return ((x + m - 1) // m) * m


def _round_down(x, m):
    return (x // m) * m


def _vmem_budget():
    """(vmem_limit_bytes, working-set budget bytes) sized per TPU generation."""
    try:
        cap = int(pltpu.get_tpu_info().vmem_capacity_bytes)
        if cap <= 0:
            raise ValueError
    except Exception:
        cap = 64 * 1024 * 1024            # assume the smallest (v7x per-core)
    limit = min(max(int(cap * 0.45), 32 * 1024 * 1024), 96 * 1024 * 1024)
    budget = (limit * 3) // 4             # headroom for Mosaic internal scratch
    return limit, budget


# --------------------------------- wrapper --------------------------------- #

def glu(x, dim=-1):
    """Pallas implementation of torch.nn.functional.glu(x, dim)."""
    nd = x.ndim
    d = dim % nd
    two_h = x.shape[d]
    if two_h % 2 != 0:
        raise ValueError("GLU split dimension must have even size")
    h = two_h // 2
    out_shape = x.shape[:d] + (h,) + x.shape[d + 1:]
    dtype = x.dtype
    isz = jnp.dtype(dtype).itemsize
    sub = max(8, 32 // isz)               # sublane multiple for this dtype
    vmem_limit, budget = _vmem_budget()
    # Bytes per output element = read a + read b + write out = 3*isz,
    # times 2 for double-buffered pipelining.
    budget_elems = max(budget // (6 * isz), 8 * 128)

    M = _prod(x.shape[:d])

    if d == nd - 1:
        # ------- split along the last (lane) axis: canonical (M, 2h) ------- #
        x2 = x.reshape(M, two_h)
        if M * h <= budget_elems:
            tm = M
        else:
            tm = max(min(_round_down(budget_elems // max(h, 1), sub),
                         _round_down(M, sub)), sub)
        # v7x megacore: try to expose >= 2 parallel blocks.
        if pl.cdiv(M, tm) < 2 and M > sub:
            tm = min(tm, _round_up(-(-M // 2), sub))
        grid = (pl.cdiv(M, tm),)
        cost = pl.CostEstimate(flops=4 * M * h, transcendentals=2 * M * h,
                               bytes_accessed=3 * M * h * isz)
        cparams = pltpu.CompilerParams(dimension_semantics=("parallel",),
                                       vmem_limit_bytes=vmem_limit)
        if h % 128 == 0:
            # Split moved into the DMA: same array passed twice, block index
            # 0 / 1 along the lane axis.
            out = pl.pallas_call(
                _glu_split_kernel,
                out_shape=jax.ShapeDtypeStruct((M, h), dtype),
                grid_spec=pltpu.PrefetchScalarGridSpec(
                    num_scalar_prefetch=0, grid=grid,
                    in_specs=[pl.BlockSpec((tm, h), lambda m: (m, 0)),
                              pl.BlockSpec((tm, h), lambda m: (m, 1))],
                    out_specs=pl.BlockSpec((tm, h), lambda m: (m, 0))),
                compiler_params=cparams, cost_estimate=cost,
            )(x2, x2)
        else:
            out = pl.pallas_call(
                _glu_fused_last_kernel,
                out_shape=jax.ShapeDtypeStruct((M, h), dtype),
                grid_spec=pltpu.PrefetchScalarGridSpec(
                    num_scalar_prefetch=0, grid=grid,
                    in_specs=[pl.BlockSpec((tm, two_h), lambda m: (m, 0))],
                    out_specs=pl.BlockSpec((tm, h), lambda m: (m, 0))),
                compiler_params=cparams, cost_estimate=cost,
            )(x2)
        return out.reshape(out_shape)

    # ------- split along a non-last axis: canonical (M, 2h, N) ------------- #
    # Trailing dims stay on the lane axis -> lane-dense loads and stores.
    N = _prod(x.shape[d + 1:])
    x3 = x.reshape(M, two_h, N)
    if h * N <= budget_elems:
        tn = N
    else:
        tn = max(min(_round_down(budget_elems // max(h, 1), 128),
                     _round_down(N, 128)), 128)
    tm = max(min(budget_elems // max(h * tn, 1), M), 1)
    # v7x megacore: try to expose >= 2 parallel blocks.
    if pl.cdiv(M, tm) * pl.cdiv(N, tn) < 2:
        if M >= 2:
            tm = -(-M // 2)
        elif N >= 256:
            tn = max(_round_down(-(-N // 2), 128), 128)
    grid = (pl.cdiv(M, tm), pl.cdiv(N, tn))
    cost = pl.CostEstimate(flops=4 * M * h * N, transcendentals=2 * M * h * N,
                           bytes_accessed=3 * M * h * N * isz)
    cparams = pltpu.CompilerParams(dimension_semantics=("parallel", "parallel"),
                                   vmem_limit_bytes=vmem_limit)
    if h % sub == 0:
        # Split moved into the DMA: same array passed twice, block index 0 / 1
        # along the (sublane) split axis.
        out = pl.pallas_call(
            _glu_split_kernel,
            out_shape=jax.ShapeDtypeStruct((M, h, N), dtype),
            grid_spec=pltpu.PrefetchScalarGridSpec(
                num_scalar_prefetch=0, grid=grid,
                in_specs=[pl.BlockSpec((tm, h, tn), lambda m, n: (m, 0, n)),
                          pl.BlockSpec((tm, h, tn), lambda m, n: (m, 1, n))],
                out_specs=pl.BlockSpec((tm, h, tn), lambda m, n: (m, 0, n))),
            compiler_params=cparams, cost_estimate=cost,
        )(x3, x3)
    else:
        out = pl.pallas_call(
            _glu_fused_mid_kernel,
            out_shape=jax.ShapeDtypeStruct((M, h, N), dtype),
            grid_spec=pltpu.PrefetchScalarGridSpec(
                num_scalar_prefetch=0, grid=grid,
                in_specs=[pl.BlockSpec((tm, two_h, tn), lambda m, n: (m, 0, n))],
                out_specs=pl.BlockSpec((tm, h, tn), lambda m, n: (m, 0, n))),
            compiler_params=cparams, cost_estimate=cost,
        )(x3)
    return out.reshape(out_shape)


# -------------------------------- reference -------------------------------- #

def glu_reference(x, dim=-1):
    a, b = jnp.split(x, 2, axis=dim)
    return a * jax.nn.sigmoid(b)


# ------------------------------ demo / check ------------------------------- #

if __name__ == "__main__":
    key = jax.random.PRNGKey(0)
    k1, k2, k3 = jax.random.split(key, 3)

    # GGANet-style usage: GLU over the channel dim of a Conv1d output (B, 2C, L).
    # h = 8 is sublane-aligned -> dual-BlockSpec (DMA-split) mid path.
    x_mid = jax.random.normal(k1, (2, 16, 64), jnp.float32)     # dim=1 -> (2, 8, 64)
    out_mid = jax.block_until_ready(glu(x_mid, dim=1))
    ref_mid = jax.block_until_ready(glu_reference(x_mid, dim=1))
    np.testing.assert_allclose(np.asarray(out_mid), np.asarray(ref_mid),
                               rtol=1e-5, atol=1e-6)

    # GLU over the last dim, lane-unaligned half (h=16) -> fallback path.
    x_last = jax.random.normal(k2, (4, 8, 32), jnp.float32)     # dim=-1 -> (4, 8, 16)
    out_last = jax.block_until_ready(glu(x_last, dim=-1))
    ref_last = jax.block_until_ready(glu_reference(x_last, dim=-1))
    np.testing.assert_allclose(np.asarray(out_last), np.asarray(ref_last),
                               rtol=1e-5, atol=1e-6)

    # GLU over the last dim, lane-aligned half (h=128) -> dual-BlockSpec path.
    x_last2 = jax.random.normal(k3, (2, 4, 256), jnp.float32)   # dim=2 -> (2, 4, 128)
    out_last2 = jax.block_until_ready(glu(x_last2, dim=2))
    ref_last2 = jax.block_until_ready(glu_reference(x_last2, dim=2))
    np.testing.assert_allclose(np.asarray(out_last2), np.asarray(ref_last2),
                               rtol=1e-5, atol=1e-6)

    print("KERNEL_OK")
</pallas_src>

<mosaic_0001>
module attributes {stable_mosaic.version = 11 : i64} {
  func.func @_glu_split_kernel(%arg0: i32, %arg1: i32, %arg2: memref<1x8x64xf32, #tpu.memory_space<vmem>>, %arg3: memref<1x8x64xf32, #tpu.memory_space<vmem>>, %arg4: memref<1x8x64xf32, #tpu.memory_space<vmem>>) attributes {dimension_semantics = [#tpu.dimension_semantics<parallel>, #tpu.dimension_semantics<parallel>], iteration_bounds = array<i64: 2, 1>, scalar_prefetch = 0 : i64, scratch_operands = 0 : i64, tpu.core_type = #tpu.core_type<tc>, window_params = [{transform_indices = @transform_0, window_bounds = array<i64: 1, 8, 64>}, {transform_indices = @transform_1, window_bounds = array<i64: 1, 8, 64>}, {transform_indices = @transform_2, window_bounds = array<i64: 1, 8, 64>}]} {
    %c0 = arith.constant 0 : index
    %c0_0 = arith.constant 0 : index
    %c0_1 = arith.constant 0 : index
    %0 = vector.load %arg3[%c0, %c0_0, %c0_1] : memref<1x8x64xf32, #tpu.memory_space<vmem>>, vector<1x8x64xf32>
    %cst = arith.constant 0.000000e+00 : f32
    %1 = vector.broadcast %cst : f32 to vector<1x8x64xf32>
    %2 = arith.subf %1, %0 : vector<1x8x64xf32>
    %3 = math.exp %2 : vector<1x8x64xf32>
    %cst_2 = arith.constant 1.000000e+00 : f32
    %4 = vector.broadcast %cst_2 : f32 to vector<1x8x64xf32>
    %5 = arith.addf %4, %3 : vector<1x8x64xf32>
    %6 = tpu.reciprocal %5 : vector<1x8x64xf32> -> vector<1x8x64xf32>
    %c0_3 = arith.constant 0 : index
    %c0_4 = arith.constant 0 : index
    %c0_5 = arith.constant 0 : index
    %7 = vector.load %arg2[%c0_3, %c0_4, %c0_5] : memref<1x8x64xf32, #tpu.memory_space<vmem>>, vector<1x8x64xf32>
    %8 = arith.mulf %7, %6 : vector<1x8x64xf32>
    %c0_6 = arith.constant 0 : index
    %c0_7 = arith.constant 0 : index
    %c0_8 = arith.constant 0 : index
    %9 = vector.load %arg4[%c0_6, %c0_7, %c0_8] : memref<1x8x64xf32, #tpu.memory_space<vmem>>, vector<1x8x64xf32>
    tpu.vector_store %arg4[%c0_6, %c0_7, %c0_8], %8 {strides = array<i32>} : memref<1x8x64xf32, #tpu.memory_space<vmem>>, vector<1x8x64xf32>,
    return
  }
  func.func @transform_0(%arg0: i32, %arg1: i32) -> (i32, i32, i32) {
    %c0_i32 = arith.constant 0 : i32
    %c0_i32_0 = arith.constant 0 : i32
    return %arg0, %c0_i32, %arg1 : i32, i32, i32
  }
  func.func @transform_1(%arg0: i32, %arg1: i32) -> (i32, i32, i32) {
    %c1_i32 = arith.constant 1 : i32
    %c0_i32 = arith.constant 0 : i32
    return %arg0, %c1_i32, %arg1 : i32, i32, i32
  }
  func.func @transform_2(%arg0: i32, %arg1: i32) -> (i32, i32, i32) {
    %c0_i32 = arith.constant 0 : i32
    %c0_i32_0 = arith.constant 0 : i32
    return %arg0, %c0_i32, %arg1 : i32, i32, i32
  }
}

</mosaic_0001>

<bundles_post_ra>
// kernel: tpu_custom_call.1
= control target key start
LH: loop header
LB: loop body
LE: loop exit
PB: predicated region body
PF: predicated region fallthrough
CT: control target
= control target key end

     0   :  { %7 = vsyncpa [#allocation3], 0  ;;  %s764_s0 = inlined_call_operand.hbm [shape: f32[2,16,64], index: 0, kind: input, shape index: {}]   ;;  %s765_s1 = inlined_call_operand.hbm [shape: f32[2,16,64], index: 1, kind: input, shape index: {}]   ;;  %s766_s2 = inlined_call_operand.hbm [shape: f32[2,8,64], index: 2, kind: output, shape index: {}]  }
   0x1   :  { %9 = vsyncpa [#allocation3 + $0x1], 0 }
   0x2   :  { %10 = vsyncpa [#allocation6], 0 }
   0x3   :  { %12 = vsyncpa [#allocation6 + $0x1], 0 }
   0x4   :  { %13 = vsyncpa [#allocation4], 0 }
   0x5   :  { %15 = vsyncpa [#allocation4 + $0x1], 0  ;;  %s603_s9 = smov 0   ;;  %s605_s10 = smov 0  }
   0x6   :  { %s607_s11 = smov 0   ;;  %s609_s12 = smov 0  }
   0x7   :  { %s611_s13 = smov 0   ;;  %s613_s14 = smov 0  }
   0x8 LB: > { %s351_s15 = sadd.s32 4294967295, %s583_s14   ;;  %s352_s16 = sadd.s32 4294967294, %s583_s14   ;;  %s583_s14 = sphi %s613_s14, %s21_s14   ;;  %s579_s13 = sphi %s611_s13, %s778_s13   ;;  %s575_s12 = sphi %s609_s12, %s777_s12   ;;  %s571_s11 = sphi %s607_s11, %s776_s11   ;;  %s567_s10 = sphi %s605_s10, %s775_s10   ;;  %s563_s9 = sphi %s603_s9, %s774_s9  }
   0x9   : > { %s33_s17 = sadd.s32 1, %s579_s13  ;;  %s42_s18 = sadd.s32 1, %s571_s11 }
   0xa   : > { %p35_p0 = scmp.ge.s32.totalorder %s33_s17, 2  ;;  %p49_p1 = scmp.ne.s32.totalorder %s571_s11, %s567_s10 }
   0xb   : > { %p50_p2 = scmp.eq.s32.totalorder %s583_s14, 0  ;;  %p55_p3 = scmp.ne.s32.totalorder %s567_s10, %s563_s9 }
   0xc   : > { %s780_s17 = smov (%p35_p0, %s33_s17), 0  ;;  %p56_p5 = scmp.eq.s32.totalorder %s351_s15, 0 }
   0xd   : > { %p644_p4 = por %p50_p2, %p49_p1  ;;  %s37_s20 = ssub.s32 %s579_s13, %s780_s17 }
   0xe   : > { %p109_p6 = scmp.eq.s32.totalorder %s351_s15, 1  ;;  %p40_p7 = scmp.eq.s32.totalorder %s37_s20, 0 }
   0xf   : > { %p650_p8 = por %p56_p5, %p55_p3  ;;  %p115_p10 = scmp.eq.s32.totalorder %s352_s16, 1 }
  0x10   : > { %p654_p9 = por %p109_p6, %p49_p1  ;;  %p388_p13 = scmp.lt.s32.totalorder %s583_s14, 2 }
  0x11   : > { %s659_s23 = scalar_select %p40_p7, %s571_s11, %s42_s18  }
  0x12   : > { %p661_p11 = por %p115_p10, %p55_p3  ;;  %s668_s25 = sand.u32 1, %s571_s11  }
  0x13   : > { %s355_s26 = sshll.u32 %s668_s25, 3  ;;  %s369_s27 = sshll.u32 %s579_s13, 8 }
  0x14   : > { %s146_s30 = scalar_lea.hbm %s764_s0, %s369_s27  ;;  %s139_s3 = scalar_lea.vmem [#allocation2], %s355_s26 }
  0x15   : > { %s148_s4 = sshll.u32 %s139_s3, 4  ;;  %p677_p0 = pnand %p388_p13, %p644_p4  ;;  %s149_s4 = int_to_ptr.vmem [resolvable:$true] %s148_s4 }
  0x16   : > { %p361_p1 = scmp.ge.s32.totalorder %s583_s14, 1  ;;  %p174_p2 = scmp.lt.s32.totalorder %s583_s14, 3 }
  0x17   : > { %s136_s6 = scalar_lea.sflag [#allocation3], %s668_s25  ;;  %p444_p3 = pneg %p677_p0 }
  0x18   : > { %s455_s7 = scalar_lea.vmem %s149_s4, 128  ;;  %s585_s8 = smov [#allocation2]  }
  0x19   : > { %p456_p5 = scmp.ne.s32.totalorder %s149_s4, %s455_s7  ;;  %s460_s15 = sshll.u32 %s585_s8, 4  ;;  %s461_s15 = int_to_ptr.vmem [resolvable:$false] %s460_s15 }
  0x1a   : > { %s462_s16 = scalar_lea.vmem %s461_s15, 256  ;;  %p463_p4 = scmp.lt.s32.totalorder %s149_s4, %s461_s15 }
  0x1b   : > { %p458_p6 = pnand %p456_p5, %p444_p3  ;;  %p464_p10 = scmp.lt.s32.totalorder %s462_s16, %s455_s7 }
  0x1d   : > { %p459_p7 = pneg %p458_p6  ;;  %p465_p13 = por %p464_p10, %p463_p4 }
  0x1f   : > { %p466_p12 = pnand %p465_p13, %p459_p7 }
  0x21   : > { %469 = shalt.err (!%p466_p12)
}
  0x22   : > { %380 = dma.hbm_to_vmem [thread:$0]  (!%p677_p0), %s146_s30, 128, %s149_s4, %s136_s6  }
  0x23   : > { %p695_p5 = pnand %p361_p1, %p174_p2  ;;  %s284_s28 = scalar_lea.hbm %s765_s1, %s369_s27 }
  0x24   : > { %s159_s29 = scalar_lea.vmem [#allocation5], %s355_s26  ;;  %s285_s7 = scalar_lea.hbm %s284_s28, 128 }
  0x25   : > { %s169_s3 = sshll.u32 %s159_s29, 4  ;;  %s156_s8 = scalar_lea.sflag [#allocation6], %s668_s25  ;;  %s170_s3 = int_to_ptr.vmem [resolvable:$true] %s169_s3 }
  0x26   : > { %s483_s15 = scalar_lea.vmem %s170_s3, 128  ;;  %s586_s30 = smov [#allocation5]  }
  0x27   : > { %p484_p12 = scmp.ne.s32.totalorder %s170_s3, %s483_s15  ;;  %s488_s4 = sshll.u32 %s586_s30, 4  ;;  %s489_s4 = int_to_ptr.vmem [resolvable:$false] %s488_s4 }
  0x28   : > { %s490_s6 = scalar_lea.vmem %s489_s4, 256  ;;  %p491_p1 = scmp.lt.s32.totalorder %s170_s3, %s489_s4 }
  0x29   : > { %p486_p6 = pnand %p484_p12, %p444_p3  ;;  %p492_p2 = scmp.lt.s32.totalorder %s490_s6, %s483_s15 }
  0x2b   : > { %p487_p7 = pneg %p486_p6  ;;  %p493_p4 = por %p492_p2, %p491_p1 }
  0x2d   : > { %p494_p10 = pnand %p493_p4, %p487_p7 }
  0x2f   : > { %497 = shalt.err (!%p494_p10)
}
  0x30   : > { %383 = dma.hbm_to_vmem [thread:$0]  (!%p677_p0), %s285_s7, 128, %s170_s3, %s156_s8  }
  0x31   : > { %178 = sbr.rel (%p695_p5) target bundleno = 107 (0x6b), region = 28  ;;  %s711_s25 = sand.u32 (!%p695_p5), 1, %s567_s10  }
  0x32   : > { %s362_s26 = sshll.u32 (!%p695_p5), %s711_s25, 3  ;;  %s181_s27 = scalar_lea.sflag (!%p695_p5), [#allocation3], %s711_s25 }
  0x33   : > { %s184_s16 = scalar_lea.vmem (!%p695_p5), [#allocation2], %s362_s26 }
  0x36   : > { %550 = dma.done.wait (%p650_p8), %s181_s27, 128  }
  0x37   : > { %552 = vsyncadd (%p650_p8), %s181_s27, 4294967168  ;;  %s190_s5 = scalar_lea.sflag [#allocation6], %s711_s25  ;;  %s193_s19 = scalar_lea.vmem [#allocation5], %s362_s26 }
  0x38   : > { %554 = dma.done.wait (%p650_p8), %s190_s5, 128  }
  0x39   : > { %556 = vsyncadd (%p650_p8), %s190_s5, 4294967168  ;;  %v219_v0 = vld [vmem:[%s193_s19] sm:$0xff]  ;;  %v225_v5 = vld [vmem:[%s184_s16] sm:$0xff]  ;;  %s218_s18 = scalar_lea.vmem [#allocation7], %s362_s26  ;;  %s366_s28 = sshll.u32 %s575_s12, 7  ;;  %vm227_vm0 = vcmask 523264  }
  0x3a   : > { %v220_v1 = vsub.f32 0.0, %v219_v0  ;;  %s244_s20 = sshll.u32 %s218_s18, 4  ;;  %s242_s3 = scalar_lea.hbm %s766_s2, %s366_s28  ;;  %s245_s20 = int_to_ptr.vmem [resolvable:$true] %s244_s20 }
  0x3b   : > { %s230_s7 = scalar_lea.sflag [#allocation4], %s711_s25  ;;  %s499_s8 = scalar_lea.vmem %s245_s20, 128 }
  0x3c   : > { %v221_v2 = vmul.f32 1.442695, %v220_v1  ;;  %p500_p8 = scmp.ne.s32.totalorder %s245_s20, %s499_s8  ;;  %s587_s15 = smov [#allocation7]  }
  0x3d   : > { %s503_s30 = sshll.u32 %s587_s15, 4  ;;  %s504_s30 = int_to_ptr.vmem [resolvable:$false] %s503_s30 }
  0x3e   : > { %438 = vpow2.f32 %v221_v2  ;;  %p501_p0 = pnand %p500_p8, %p654_p9  ;;  %s505_s4 = scalar_lea.vmem %s504_s30, 256 }
  0x3f   : > { %p506_p13 = scmp.lt.s32.totalorder %s245_s20, %s504_s30  ;;  %p507_p5 = scmp.lt.s32.totalorder %s505_s4, %s499_s8 }
  0x40   : > { %p502_p3 = pneg %p501_p0 }
  0x41   : > { %p508_p12 = por %p507_p5, %p506_p13 }
  0x43   : > { %p509_p6 = pnand %p508_p12, %p502_p3 }
  0x4b   : > { %v439_v3 = vpop.eup %438 }
  0x4c   : > { %v223_v4 = vadd.f32 1.0, %v439_v3 }
  0x4e   : > { %440 = vrcp.f32 %v223_v4 }
  0x5b   : > { %v441_v6 = vpop.eup %440 }
  0x5c   : > { %v226_v7 = vmul.f32 %v441_v6, %v225_v5 }
  0x5e   : > { %228 = vst.msk [vmem:[%s218_s18] sm:$0xff] %vm227_vm0, %v226_v7 }
  0x5f   : > { %512 = shalt.err (!%p509_p6)
}
  0x60   : > { %s513_s12 = scalar_lea.hbm %s242_s3, 128  ;;  %s517_s26 = scalar_lea.hbm %s766_s2, 256 }
  0x61   : > { %p514_p7 = scmp.ne.s32.totalorder %s242_s3, %s513_s12  ;;  %p518_p4 = scmp.lt.s32.totalorder %s242_s3, %s766_s2 }
  0x62   : > { %p519_p10 = scmp.lt.s32.totalorder %s517_s26, %s513_s12 }
  0x63   : > { %p515_p1 = pnand %p514_p7, %p654_p9 }
  0x64   : > { %p520_p8 = por %p519_p10, %p518_p4 }
  0x65   : > { %p516_p2 = pneg %p515_p1 }
  0x67   : > { %p521_p0 = pnand %p520_p8, %p516_p2 }
  0x69   : > { %524 = shalt.err (!%p521_p0)
}
  0x6a   : > { %375 = dma.vmem_to_hbm [thread:$0]  (%p654_p9), %s245_s20, 128, %s242_s3, %s230_s7  }
  0x6b PF: > { %s256_s5 = sand.u32 1, %s563_s9   ;;  %p773_p3 = scmp.ge.s32.totalorder %s583_s14, 2 }
  0x6c   : > { %s257_s19 = scalar_lea.sflag [#allocation4], %s256_s5 }
  0x6d   : > { %p385_p13 = pnand %p773_p3, %p661_p11 }
  0x6f   : > { %p386_p5 = pneg %p385_p13 }
  0x71   : > { %558 = dma.done.wait (%p386_p5), %s257_s19, 128  }
  0x72   : > { %560 = vsyncadd (%p386_p5), %s257_s19, 4294967168  ;;  %s21_s14 = sadd.s32 1, %s583_s14   ;;  %s774_s9 = smov %s567_s10 }
  0x73   : > { %p18_p12 = scmp.ge.s32.totalorder %s21_s14, 4   ;;  %s775_s10 = smov %s571_s11 }
  0x74   : > { %s776_s11 = smov %s659_s23  ;;  %s777_s12 = smov %s579_s13 }
  0x75   : > { %s778_s13 = smov %s780_s17  ;;  %20 = sbr.rel (!%p18_p12) target bundleno = 8 (0x8), region = 86 }
  0x7a   :  { %262 = vsyncpa [#allocation3], 1 }
  0x7b   :  { %264 = vsyncpa [#allocation3 + $0x1], 1 }
  0x7c   :  { %265 = vsyncpa [#allocation6], 1 }
  0x7d   :  { %267 = vsyncpa [#allocation6 + $0x1], 1 }
  0x7e   :  { %268 = vsyncpa [#allocation4], 1 }
  0x7f   :  { %270 = vsyncpa [#allocation4 + $0x1], 1 }

</bundles_post_ra>
